<compile_context>
chip_gen: v5e
topology: v5e:2x2
jax: 0.10.0
libtpu: 0.0.40
codegen_flags: <defaults>
</compile_context>

<pallas_src>
import jax
import jax.numpy as jnp
from jax.experimental import pallas as pl
from jax.experimental.pallas import tpu as pltpu

_LANE_CHOICES = (512, 256, 128)          # lane-dense last dims (multiples of 128)
_BLOCK_TARGET_BYTES = 2 * 1024 * 1024    # ~2 MiB per tile per buffer
_SMALL_BYTES = 2 * 1024 * 1024           # below this, plain XLA fused add wins


def _round_up(a: int, b: int) -> int:
    return ((a + b - 1) // b) * b


def _buffer_add_kernel(c_ref, x_ref, o_ref):
    # c_ref: SMEM (1,) f32 holding the pre-folded (sub_buffer0_u + sub_buffer0_p).
    # x_ref / o_ref: (tm, LANE) VMEM tiles.  Add in f32 (exact for f32 x,
    # matches PyTorch promotion for low-precision x), cast on store.
    o_ref[...] = (x_ref[...].astype(jnp.float32) + c_ref[0]).astype(o_ref.dtype)


def buffer_module_nested(x, buffer_u, buffer_p, *, force_pallas: bool = False):
    """forward(x) = x + buffer_u + buffer_p (elementwise broadcast)."""
    buffer_u = jnp.asarray(buffer_u)
    buffer_p = jnp.asarray(buffer_p)
    out_dtype = jnp.result_type(x.dtype, buffer_u.dtype, buffer_p.dtype)

    # Fold the two broadcast buffers into one f32 scalar.
    c32 = (buffer_u.astype(jnp.float32).reshape(())
           + buffer_p.astype(jnp.float32).reshape(-1)[0])

    n = x.size
    in_bytes = n * x.dtype.itemsize

    # Largest lane width in {512, 256, 128} that divides n exactly, keeping the
    # (rows, LANE) view a pure metadata reshape (no copy, no padding).
    lane = next((l for l in _LANE_CHOICES if l <= n and n % l == 0), None)

    # Fast path: tiny inputs or lane-misaligned n -> XLA's fused elementwise add
    # (already at HBM roofline; avoids pallas dispatch / per-step overhead).
    if n == 0 or lane is None or (not force_pallas and in_bytes <= _SMALL_BYTES):
        return x.astype(out_dtype) + c32.astype(out_dtype)

    rows = n // lane
    x2d = x.reshape(rows, lane)          # contiguous reshape: no HBM copy

    itemsize = max(x.dtype.itemsize, jnp.dtype(out_dtype).itemsize)
    if rows <= 8:
        # Only reachable via force_pallas on tiny inputs: one full-extent block.
        tm = rows
    else:
        # ~2 MiB tile target (multiple of 8 sublanes), but never fewer than
        # 2 grid steps so v7x's two TensorCores can split the parallel axis.
        tm_cap = max(8, (_BLOCK_TARGET_BYTES // (lane * itemsize)) // 8 * 8)
        tm = max(8, min(tm_cap, _round_up(pl.cdiv(rows, 2), 8)))
    grid = (pl.cdiv(rows, tm),)          # ragged last block masked by Pallas

    c = c32.reshape(1)                   # folded scalar, lives in SMEM

    out2d = pl.pallas_call(
        _buffer_add_kernel,
        out_shape=jax.ShapeDtypeStruct((rows, lane), out_dtype),
        grid=grid,
        in_specs=[
            pl.BlockSpec(memory_space=pltpu.SMEM),        # folded scalar
            pl.BlockSpec((tm, lane), lambda i: (i, 0)),   # x tile
        ],
        out_specs=pl.BlockSpec((tm, lane), lambda i: (i, 0)),
        compiler_params=pltpu.CompilerParams(
            dimension_semantics=("parallel",),
        ),
        cost_estimate=pl.CostEstimate(
            flops=n,
            transcendentals=0,
            bytes_accessed=n * x.dtype.itemsize + n * jnp.dtype(out_dtype).itemsize,
        ),
    )(c, x2d)

    return out2d.reshape(x.shape)


if __name__ == "__main__":
    key = jax.random.PRNGKey(0)
    k_small, k_med = jax.random.split(key)

    # Deterministic buffers exactly as registered in __init__.
    sub_buffer0_u = jnp.array(1.0, dtype=jnp.float32)     # 0-d scalar buffer
    sub_buffer0_p = jnp.array([2.0], dtype=jnp.float32)   # shape-(1,) buffer

    # (1) The module's nominal small NCHW input -> small-input fast path.
    x_small = jax.random.normal(k_small, (2, 4, 16, 16), dtype=jnp.float32)
    out_small = jax.block_until_ready(
        buffer_module_nested(x_small, sub_buffer0_u, sub_buffer0_p))
    ref_small = x_small + sub_buffer0_u + sub_buffer0_p
    assert out_small.shape == x_small.shape and out_small.dtype == ref_small.dtype
    assert jnp.allclose(out_small, ref_small, atol=1e-6, rtol=1e-6)

    # (2) A medium input forced through the Pallas path.  rows=300, tm=152,
    #     grid=(2,): exercises multi-step pipelining AND a ragged (masked)
    #     last row-block, with no padding / slicing round trips.
    x_med = jax.random.normal(k_med, (3, 4, 100, 128), dtype=jnp.float32)
    out_med = jax.block_until_ready(
        buffer_module_nested(x_med, sub_buffer0_u, sub_buffer0_p, force_pallas=True))
    ref_med = x_med + sub_buffer0_u + sub_buffer0_p
    assert out_med.shape == x_med.shape and out_med.dtype == ref_med.dtype
    assert jnp.allclose(out_med, ref_med, atol=1e-6, rtol=1e-6)

    print("KERNEL_OK")
</pallas_src>

<mosaic_0001>
module attributes {stable_mosaic.version = 11 : i64} {
  func.func @_buffer_add_kernel(%arg0: i32, %arg1: memref<1xf32, #tpu.memory_space<smem>>, %arg2: memref<152x512xf32, #tpu.memory_space<vmem>>, %arg3: memref<152x512xf32, #tpu.memory_space<vmem>>) attributes {dimension_semantics = [#tpu.dimension_semantics<parallel>], iteration_bounds = array<i64: 2>, scalar_prefetch = 0 : i64, scratch_operands = 0 : i64, tpu.core_type = #tpu.core_type<tc>, window_params = [{transform_indices = @transform_0, window_bounds = array<i64: 1>}, {transform_indices = @transform_1, window_bounds = array<i64: 152, 512>}, {transform_indices = @transform_2, window_bounds = array<i64: 152, 512>}]} {
    %c0 = arith.constant 0 : index
    %c0_0 = arith.constant 0 : index
    %0 = vector.load %arg2[%c0, %c0_0] : memref<152x512xf32, #tpu.memory_space<vmem>>, vector<152x512xf32>
    %c0_1 = arith.constant 0 : index
    %1 = memref.load %arg1[%c0_1] : memref<1xf32, #tpu.memory_space<smem>>
    %2 = vector.broadcast %1 : f32 to vector<152x512xf32>
    %3 = arith.addf %0, %2 : vector<152x512xf32>
    %c0_2 = arith.constant 0 : index
    %c0_3 = arith.constant 0 : index
    %4 = vector.load %arg3[%c0_2, %c0_3] : memref<152x512xf32, #tpu.memory_space<vmem>>, vector<152x512xf32>
    tpu.vector_store %arg3[%c0_2, %c0_3], %3 {strides = array<i32>} : memref<152x512xf32, #tpu.memory_space<vmem>>, vector<152x512xf32>,
    return
  }
  func.func @transform_0(%arg0: i32) -> i32 {
    %c0_i32 = arith.constant 0 : i32
    %c0_i32_0 = arith.constant 0 : i32
    return %c0_i32 : i32
  }
  func.func @transform_1(%arg0: i32) -> (i32, i32) {
    %c0_i32 = arith.constant 0 : i32
    %c0_i32_0 = arith.constant 0 : i32
    return %arg0, %c0_i32 : i32, i32
  }
  func.func @transform_2(%arg0: i32) -> (i32, i32) {
    %c0_i32 = arith.constant 0 : i32
    %c0_i32_0 = arith.constant 0 : i32
    return %arg0, %c0_i32 : i32, i32
  }
}

</mosaic_0001>

<bundles_post_ra>
// kernel: tpu_custom_call.1
= control target key start
LH: loop header
LB: loop body
LE: loop exit
PB: predicated region body
PF: predicated region fallthrough
CT: control target
= control target key end

     0   :  { %s1028_s0 = inlined_call_operand.<no memory space> [shape: f32[1], index: 0, kind: input, shape index: {}]   ;;  %s1029_s1 = inlined_call_operand.hbm [shape: f32[300,512], index: 1, kind: input, shape index: {}]   ;;  %s1030_s2 = inlined_call_operand.hbm [shape: f32[300,512], index: 2, kind: output, shape index: {}]  }
   0x1   :  { %7 = sst [smem:[#allocation2]] %s1028_s0 }
   0x2   :  { %8 = vsyncpa [#allocation4], 0 }
   0x3   :  { %10 = vsyncpa [#allocation4 + $0x1], 0 }
   0x4   :  { %11 = vsyncpa [#allocation5], 0 }
   0x5   :  { %13 = vsyncpa [#allocation5 + $0x1], 0  ;;  %s676_s11 = smov 0   ;;  %s678_s12 = smov 0  }
   0x6   :  { %s680_s13 = smov 0   ;;  %s682_s14 = smov 0  }
   0x7 LB: > { %s697_s0 = sadd.s32 4294967295, %s652_s14   ;;  %s488_s15 = sadd.s32 4294967294, %s652_s14   ;;  %s652_s14 = sphi %s682_s14, %s1038_s14   ;;  %s648_s13 = sphi %s680_s13, %s1037_s13   ;;  %s644_s12 = sphi %s678_s12, %s1036_s12   ;;  %s640_s11 = sphi %s676_s11, %s1035_s11  }
   0x8   : > { %s701_s16 = sadd.s32 1, %s652_s14   ;;  %s47_s17 = sadd.s32 1, %s648_s13 }
   0x9   : > { %s44_s18 = ssub.s32 %s652_s14, %s701_s16  ;;  %p54_p0 = scmp.ne.s32.totalorder %s648_s13, %s644_s12 }
   0xa   : > { %p45_p1 = scmp.eq.s32.totalorder %s44_s18, 0  ;;  %p55_p2 = scmp.eq.s32.totalorder %s652_s14, 0 }
   0xb   : > { %p60_p3 = scmp.ne.s32.totalorder %s644_s12, %s640_s11  ;;  %p61_p4 = scmp.eq.s32.totalorder %s697_s0, 0 }
   0xc   : > { %s713_s19 = scalar_select %p45_p1, %s648_s13, %s47_s17  }
   0xd   : > { %p56_p5 = por %p55_p2, %p54_p0  ;;  %p715_p6 = por %p61_p4, %p60_p3 }
   0xe   : > { %p84_p7 = scmp.eq.s32.totalorder %s697_s0, 1  ;;  %p90_p8 = scmp.eq.s32.totalorder %s488_s15, 1 }
   0xf   : > { %p490_p9 = scmp.ge.s32.totalorder %s652_s14, 2  ;;  %p518_p10 = scmp.lt.s32.totalorder %s652_s14, 2 }
  0x10   : > { %p722_p11 = por %p84_p7, %p54_p0  ;;  %p726_p12 = por %p90_p8, %p60_p3 }
  0x11   : > { %s113_s23 = sand.u32 1, %s648_s13   ;;  %s502_s24 = smul.u32 608, %s652_s14 }
  0x12   : > { %s504_s25 = smul.u32 608, %s113_s23  ;;  %p735_p13 = pnand %p518_p10, %p56_p5 }
  0x13   : > { %s123_s28 = scalar_lea.hbm %s1029_s1, %s502_s24  ;;  %s114_s5 = scalar_lea.sflag [#allocation4], %s113_s23 }
  0x14   : > { %s124_s30 = sshll.u32 %s123_s28, 4  ;;  %s117_s3 = scalar_lea.vmem [#allocation3], %s504_s25  ;;  %s125_s30 = int_to_ptr.hbm [resolvable:$true] %s124_s30 }
  0x15   : > { %s126_s4 = sshll.u32 %s117_s3, 4  ;;  %s556_s6 = sshra.s32 %s125_s30, 4  ;;  %s127_s4 = int_to_ptr.vmem [resolvable:$true] %s126_s4  ;;  %s557_s6 = int_to_ptr.hbm [resolvable:$true] %s556_s6 }
  0x16   : > { %s558_s7 = scalar_lea.hbm %s557_s6, 608  ;;  %p560_p1 = pneg %p735_p13 }
  0x17   : > { %p559_p0 = scmp.ne.s32.totalorder %s557_s6, %s558_s7  ;;  %s563_s10 = scalar_lea.hbm %s1029_s1, 1216 }
  0x18   : > { %p564_p4 = scmp.lt.s32.totalorder %s557_s6, %s1029_s1  ;;  %p565_p5 = scmp.lt.s32.totalorder %s563_s10, %s558_s7 }
  0x19   : > { %p561_p2 = pnand %p560_p1, %p559_p0 }
  0x1a   : > { %p566_p7 = por %p565_p5, %p564_p4 }
  0x1b   : > { %p562_p3 = pneg %p561_p2 }
  0x1d   : > { %p567_p8 = pnand %p566_p7, %p562_p3 }
  0x1f   : > { %570 = shalt.err (!%p567_p8)
}
  0x20   : > { %s654_s18 = smov 512   ;;  %s655_s23 = smov 32  }
  0x21   : > { %513 = dma.hbm_to_vmem [thread:$0]  (!%p735_p13), %s125_s30, 9728, %s127_s4, %s114_s5, %s654_s18, %s654_s18, %s655_s23  }
  0x22   : > { %p493_p10 = scmp.ge.s32.totalorder %s652_s14, 1  ;;  %p134_p0 = scmp.lt.s32.totalorder %s652_s14, 3 }
  0x24   : > { %p135_p1 = pnand %p493_p10, %p134_p0 }
  0x25   : > { %s752_s24 = sand.u32 (!%p135_p1), 1, %s644_s12  }
  0x26   : > { %138 = sbr.rel (%p135_p1) target bundleno = 132 (0x84), region = 28  ;;  %s141_s26 = scalar_lea.sflag (!%p135_p1), [#allocation4], %s752_s24 }
  0x27   : > { %s505_s25 = smul.u32 (!%p135_p1), 608, %s752_s24 }
  0x29   : > { %s756_s27 = scalar_lea.vmem (!%p135_p1), [#allocation3], %s505_s25 }
  0x2b   : > { %631 = dma.done.wait (%p715_p6), %s141_s26, 9728  }
  0x2c   : > { %633 = vsyncadd (%p715_p6), %s141_s26, 4294957568  ;;  %s244_s28 = sld [smem:[#allocation2]]  ;;  %v168_v0 = vld [vmem:[%s756_s27] sm:$0xff]  ;;  %v169_v2 = vld [vmem:[%s756_s27 + $0x8] sm:$0xff]  ;;  %s775_s20 = scalar_lea.vmem [#allocation6], %s505_s25 }
  0x2d   : > { %v170_v3 = vld [vmem:[%s756_s27 + $0x10] sm:$0xff]  ;;  %v171_v7 = vld [vmem:[%s756_s27 + $0x18] sm:$0xff]  ;;  %v172_v8 = vld [vmem:[%s756_s27 + $0x20] sm:$0xff]  ;;  %s503_s29 = smul.u32 608, %s697_s0  ;;  %s412_s4 = sshll.u32 %s775_s20, 4  ;;  %s413_s4 = int_to_ptr.vmem [resolvable:$true] %s412_s4 }
  0x2e   : > { %v173_v9 = vld [vmem:[%s756_s27 + $0x28] sm:$0xff]  ;;  %v174_v11 = vld [vmem:[%s756_s27 + $0x30] sm:$0xff]  ;;  %v175_v13 = vld [vmem:[%s756_s27 + $0x38] sm:$0xff]  ;;  %s399_s6 = scalar_lea.sflag [#allocation5], %s752_s24  ;;  %s606_s15 = scalar_lea.hbm %s1030_s2, 1216 }
  0x2f   : > { %v176_v15 = vld [vmem:[%s756_s27 + $0x40] sm:$0xff]  ;;  %v177_v17 = vld [vmem:[%s756_s27 + $0x48] sm:$0xff]  ;;  %v178_v19 = vld [vmem:[%s756_s27 + $0x50] sm:$0xff]  ;;  %s411_s3 = scalar_lea.hbm %s1030_s2, %s503_s29 }
  0x30   : > { %v179_v21 = vld [vmem:[%s756_s27 + $0x58] sm:$0xff]  ;;  %v180_v23 = vld [vmem:[%s756_s27 + $0x60] sm:$0xff]  ;;  %v181_v25 = vld [vmem:[%s756_s27 + $0x68] sm:$0xff]  ;;  %s414_s5 = sshll.u32 %s411_s3, 4  ;;  %s415_s5 = int_to_ptr.hbm [resolvable:$true] %s414_s5 }
  0x31   : > { %v182_v27 = vld [vmem:[%s756_s27 + $0x70] sm:$0xff]  ;;  %v183_v29 = vld [vmem:[%s756_s27 + $0x78] sm:$0xff]  ;;  %v184_v31 = vld [vmem:[%s756_s27 + $0x80] sm:$0xff]  ;;  %s600_s7 = sshra.s32 %s415_s5, 4  ;;  %s601_s7 = int_to_ptr.hbm [resolvable:$true] %s600_s7 }
  0x32   : > { %v763_v1 = vstv %s244_s28  ;;  %v185_v33 = vld [vmem:[%s756_s27 + $0x88] sm:$0xff]  ;;  %v186_v35 = vld [vmem:[%s756_s27 + $0x90] sm:$0xff]  ;;  %v187_v37 = vld [vmem:[%s756_s27 + $0x98] sm:$0xff]  ;;  %s602_s8 = scalar_lea.hbm %s601_s7, 608  ;;  %p607_p3 = scmp.lt.s32.totalorder %s601_s7, %s1030_s2 }
  0x33   : > { %v246_v4 = vadd.f32 %v763_v1, %v168_v0  ;;  %v247_v5 = vadd.f32 %v763_v1, %v169_v2  ;;  %v248_v6 = vadd.f32 %v763_v1, %v170_v3  ;;  %v249_v10 = vadd.f32 %v763_v1, %v171_v7  ;;  %v188_v39 = vld [vmem:[%s756_s27 + $0xa0] sm:$0xff]  ;;  %v189_v41 = vld [vmem:[%s756_s27 + $0xa8] sm:$0xff]  ;;  %v190_v43 = vld [vmem:[%s756_s27 + $0xb0] sm:$0xff]  ;;  %p603_p6 = scmp.ne.s32.totalorder %s601_s7, %s602_s8  ;;  %p608_p4 = scmp.lt.s32.totalorder %s606_s15, %s602_s8 }
  0x34   : > { %v250_v12 = vadd.f32 %v763_v1, %v172_v8  ;;  %v251_v14 = vadd.f32 %v763_v1, %v173_v9  ;;  %v252_v16 = vadd.f32 %v763_v1, %v174_v11  ;;  %v253_v18 = vadd.f32 %v763_v1, %v175_v13  ;;  %v191_v45 = vld [vmem:[%s756_s27 + $0xb8] sm:$0xff]  ;;  %v192_v47 = vld [vmem:[%s756_s27 + $0xc0] sm:$0xff]  ;;  %v193_v49 = vld [vmem:[%s756_s27 + $0xc8] sm:$0xff] }
  0x35   : > { %322 = vst [vmem:[%s775_s20] sm:$0xff] %v246_v4  ;;  %v254_v20 = vadd.f32 %v763_v1, %v176_v15  ;;  %v255_v22 = vadd.f32 %v763_v1, %v177_v17  ;;  %v256_v24 = vadd.f32 %v763_v1, %v178_v19  ;;  %v257_v26 = vadd.f32 %v763_v1, %v179_v21  ;;  %v194_v51 = vld [vmem:[%s756_s27 + $0xd0] sm:$0xff]  ;;  %v195_v53 = vld [vmem:[%s756_s27 + $0xd8] sm:$0xff]  ;;  %v196_v55 = vld [vmem:[%s756_s27 + $0xe0] sm:$0xff]  ;;  %p604_p13 = pnand %p603_p6, %p722_p11  ;;  %p609_p5 = por %p608_p4, %p607_p3 }
  0x36   : > { %323 = vst [vmem:[%s775_s20 + $0x8] sm:$0xff] %v247_v5  ;;  %v258_v28 = vadd.f32 %v763_v1, %v180_v23  ;;  %v259_v30 = vadd.f32 %v763_v1, %v181_v25  ;;  %v260_v32 = vadd.f32 %v763_v1, %v182_v27  ;;  %v261_v34 = vadd.f32 %v763_v1, %v183_v29  ;;  %v197_v57 = vld [vmem:[%s756_s27 + $0xe8] sm:$0xff]  ;;  %v198_v59 = vld [vmem:[%s756_s27 + $0xf0] sm:$0xff]  ;;  %v199_v61 = vld [vmem:[%s756_s27 + $0xf8] sm:$0xff] }
  0x37   : > { %324 = vst [vmem:[%s775_s20 + $0x10] sm:$0xff] %v248_v6  ;;  %v262_v36 = vadd.f32 %v763_v1, %v184_v31  ;;  %v263_v38 = vadd.f32 %v763_v1, %v185_v33  ;;  %v264_v40 = vadd.f32 %v763_v1, %v186_v35  ;;  %v265_v42 = vadd.f32 %v763_v1, %v187_v37  ;;  %v200_v63 = vld [vmem:[%s756_s27 + $0x100] sm:$0xff]  ;;  %v201_v2 = vld [vmem:[%s756_s27 + $0x108] sm:$0xff]  ;;  %v202_v4 = vld [vmem:[%s756_s27 + $0x110] sm:$0xff]  ;;  %p605_p2 = pneg %p604_p13 }
  0x38   : > { %325 = vst [vmem:[%s775_s20 + $0x18] sm:$0xff] %v249_v10  ;;  %v266_v44 = vadd.f32 %v763_v1, %v188_v39  ;;  %v267_v46 = vadd.f32 %v763_v1, %v189_v41  ;;  %v268_v48 = vadd.f32 %v763_v1, %v190_v43  ;;  %v269_v50 = vadd.f32 %v763_v1, %v191_v45  ;;  %v203_v6 = vld [vmem:[%s756_s27 + $0x118] sm:$0xff]  ;;  %v204_v8 = vld [vmem:[%s756_s27 + $0x120] sm:$0xff]  ;;  %v205_v10 = vld [vmem:[%s756_s27 + $0x128] sm:$0xff] }
  0x39   : > { %326 = vst [vmem:[%s775_s20 + $0x20] sm:$0xff] %v250_v12  ;;  %v270_v52 = vadd.f32 %v763_v1, %v192_v47  ;;  %v271_v54 = vadd.f32 %v763_v1, %v193_v49  ;;  %v272_v56 = vadd.f32 %v763_v1, %v194_v51  ;;  %v273_v58 = vadd.f32 %v763_v1, %v195_v53  ;;  %v206_v12 = vld [vmem:[%s756_s27 + $0x130] sm:$0xff]  ;;  %p610_p7 = pnand %p609_p5, %p605_p2 }
  0x3a   : > { %327 = vst [vmem:[%s775_s20 + $0x28] sm:$0xff] %v251_v14  ;;  %v274_v60 = vadd.f32 %v763_v1, %v196_v55  ;;  %v275_v62 = vadd.f32 %v763_v1, %v197_v57  ;;  %v276_v0 = vadd.f32 %v763_v1, %v198_v59  ;;  %v277_v3 = vadd.f32 %v763_v1, %v199_v61  ;;  %v207_v14 = vld [vmem:[%s756_s27 + $0x138] sm:$0xff] }
  0x3b   : > { %328 = vst [vmem:[%s775_s20 + $0x30] sm:$0xff] %v252_v16  ;;  %v278_v5 = vadd.f32 %v763_v1, %v200_v63  ;;  %v279_v7 = vadd.f32 %v763_v1, %v201_v2  ;;  %v280_v9 = vadd.f32 %v763_v1, %v202_v4  ;;  %v281_v11 = vadd.f32 %v763_v1, %v203_v6  ;;  %v208_v16 = vld [vmem:[%s756_s27 + $0x140] sm:$0xff] }
  0x3c   : > { %329 = vst [vmem:[%s775_s20 + $0x38] sm:$0xff] %v253_v18  ;;  %v282_v13 = vadd.f32 %v763_v1, %v204_v8  ;;  %v283_v15 = vadd.f32 %v763_v1, %v205_v10  ;;  %v284_v17 = vadd.f32 %v763_v1, %v206_v12  ;;  %v209_v18 = vld [vmem:[%s756_s27 + $0x148] sm:$0xff]  ;;  %v285_v19 = vadd.f32 %v763_v1, %v207_v14 }
  0x3d   : > { %330 = vst [vmem:[%s775_s20 + $0x40] sm:$0xff] %v254_v20  ;;  %v210_v20 = vld [vmem:[%s756_s27 + $0x150] sm:$0xff]  ;;  %v286_v21 = vadd.f32 %v763_v1, %v208_v16  ;;  %v287_v23 = vadd.f32 %v763_v1, %v209_v18 }
  0x3e   : > { %331 = vst [vmem:[%s775_s20 + $0x48] sm:$0xff] %v255_v22  ;;  %v211_v22 = vld [vmem:[%s756_s27 + $0x158] sm:$0xff]  ;;  %v288_v25 = vadd.f32 %v763_v1, %v210_v20 }
  0x3f   : > { %332 = vst [vmem:[%s775_s20 + $0x50] sm:$0xff] %v256_v24  ;;  %v212_v24 = vld [vmem:[%s756_s27 + $0x160] sm:$0xff]  ;;  %v289_v27 = vadd.f32 %v763_v1, %v211_v22 }
  0x40   : > { %333 = vst [vmem:[%s775_s20 + $0x58] sm:$0xff] %v257_v26  ;;  %v213_v26 = vld [vmem:[%s756_s27 + $0x168] sm:$0xff]  ;;  %v290_v29 = vadd.f32 %v763_v1, %v212_v24 }
  0x41   : > { %334 = vst [vmem:[%s775_s20 + $0x60] sm:$0xff] %v258_v28  ;;  %v214_v28 = vld [vmem:[%s756_s27 + $0x170] sm:$0xff]  ;;  %v291_v31 = vadd.f32 %v763_v1, %v213_v26 }
  0x42   : > { %335 = vst [vmem:[%s775_s20 + $0x68] sm:$0xff] %v259_v30  ;;  %v215_v30 = vld [vmem:[%s756_s27 + $0x178] sm:$0xff]  ;;  %v292_v33 = vadd.f32 %v763_v1, %v214_v28 }
  0x43   : > { %336 = vst [vmem:[%s775_s20 + $0x70] sm:$0xff] %v260_v32  ;;  %v216_v32 = vld [vmem:[%s756_s27 + $0x180] sm:$0xff]  ;;  %v293_v35 = vadd.f32 %v763_v1, %v215_v30 }
  0x44   : > { %337 = vst [vmem:[%s775_s20 + $0x78] sm:$0xff] %v261_v34  ;;  %v217_v34 = vld [vmem:[%s756_s27 + $0x188] sm:$0xff]  ;;  %v294_v37 = vadd.f32 %v763_v1, %v216_v32 }
  0x45   : > { %338 = vst [vmem:[%s775_s20 + $0x80] sm:$0xff] %v262_v36  ;;  %v218_v36 = vld [vmem:[%s756_s27 + $0x190] sm:$0xff]  ;;  %v295_v39 = vadd.f32 %v763_v1, %v217_v34 }
  0x46   : > { %339 = vst [vmem:[%s775_s20 + $0x88] sm:$0xff] %v263_v38  ;;  %v219_v38 = vld [vmem:[%s756_s27 + $0x198] sm:$0xff]  ;;  %v296_v41 = vadd.f32 %v763_v1, %v218_v36 }
  0x47   : > { %340 = vst [vmem:[%s775_s20 + $0x90] sm:$0xff] %v264_v40  ;;  %v220_v40 = vld [vmem:[%s756_s27 + $0x1a0] sm:$0xff]  ;;  %v297_v43 = vadd.f32 %v763_v1, %v219_v38 }
  0x48   : > { %341 = vst [vmem:[%s775_s20 + $0x98] sm:$0xff] %v265_v42  ;;  %v221_v42 = vld [vmem:[%s756_s27 + $0x1a8] sm:$0xff]  ;;  %v298_v45 = vadd.f32 %v763_v1, %v220_v40 }
  0x49   : > { %342 = vst [vmem:[%s775_s20 + $0xa0] sm:$0xff] %v266_v44  ;;  %v222_v44 = vld [vmem:[%s756_s27 + $0x1b0] sm:$0xff]  ;;  %v299_v47 = vadd.f32 %v763_v1, %v221_v42 }
  0x4a   : > { %343 = vst [vmem:[%s775_s20 + $0xa8] sm:$0xff] %v267_v46  ;;  %v223_v46 = vld [vmem:[%s756_s27 + $0x1b8] sm:$0xff]  ;;  %v300_v49 = vadd.f32 %v763_v1, %v222_v44 }
  0x4b   : > { %344 = vst [vmem:[%s775_s20 + $0xb0] sm:$0xff] %v268_v48  ;;  %v224_v48 = vld [vmem:[%s756_s27 + $0x1c0] sm:$0xff]  ;;  %v301_v51 = vadd.f32 %v763_v1, %v223_v46 }
  0x4c   : > { %345 = vst [vmem:[%s775_s20 + $0xb8] sm:$0xff] %v269_v50  ;;  %v225_v50 = vld [vmem:[%s756_s27 + $0x1c8] sm:$0xff]  ;;  %v302_v53 = vadd.f32 %v763_v1, %v224_v48 }
  0x4d   : > { %346 = vst [vmem:[%s775_s20 + $0xc0] sm:$0xff] %v270_v52  ;;  %v226_v52 = vld [vmem:[%s756_s27 + $0x1d0] sm:$0xff]  ;;  %v303_v55 = vadd.f32 %v763_v1, %v225_v50 }
  0x4e   : > { %347 = vst [vmem:[%s775_s20 + $0xc8] sm:$0xff] %v271_v54  ;;  %v227_v54 = vld [vmem:[%s756_s27 + $0x1d8] sm:$0xff]  ;;  %v304_v57 = vadd.f32 %v763_v1, %v226_v52 }
  0x4f   : > { %348 = vst [vmem:[%s775_s20 + $0xd0] sm:$0xff] %v272_v56  ;;  %v228_v56 = vld [vmem:[%s756_s27 + $0x1e0] sm:$0xff]  ;;  %v305_v59 = vadd.f32 %v763_v1, %v227_v54 }
  0x50   : > { %349 = vst [vmem:[%s775_s20 + $0xd8] sm:$0xff] %v273_v58  ;;  %v229_v58 = vld [vmem:[%s756_s27 + $0x1e8] sm:$0xff]  ;;  %v306_v61 = vadd.f32 %v763_v1, %v228_v56 }
  0x51   : > { %350 = vst [vmem:[%s775_s20 + $0xe0] sm:$0xff] %v274_v60  ;;  %v230_v60 = vld [vmem:[%s756_s27 + $0x1f0] sm:$0xff]  ;;  %v307_v63 = vadd.f32 %v763_v1, %v229_v58 }
  0x52   : > { %351 = vst [vmem:[%s775_s20 + $0xe8] sm:$0xff] %v275_v62  ;;  %v231_v62 = vld [vmem:[%s756_s27 + $0x1f8] sm:$0xff]  ;;  %v308_v2 = vadd.f32 %v763_v1, %v230_v60 }
  0x53   : > { %352 = vst [vmem:[%s775_s20 + $0xf0] sm:$0xff] %v276_v0  ;;  %v232_v0 = vld [vmem:[%s756_s27 + $0x200] sm:$0xff]  ;;  %v309_v4 = vadd.f32 %v763_v1, %v231_v62 }
  0x54   : > { %353 = vst [vmem:[%s775_s20 + $0xf8] sm:$0xff] %v277_v3  ;;  %v233_v3 = vld [vmem:[%s756_s27 + $0x208] sm:$0xff]  ;;  %v310_v6 = vadd.f32 %v763_v1, %v232_v0 }
  0x55   : > { %354 = vst [vmem:[%s775_s20 + $0x100] sm:$0xff] %v278_v5  ;;  %v234_v5 = vld [vmem:[%s756_s27 + $0x210] sm:$0xff]  ;;  %v311_v8 = vadd.f32 %v763_v1, %v233_v3 }
  0x56   : > { %355 = vst [vmem:[%s775_s20 + $0x108] sm:$0xff] %v279_v7  ;;  %v235_v7 = vld [vmem:[%s756_s27 + $0x218] sm:$0xff]  ;;  %v312_v10 = vadd.f32 %v763_v1, %v234_v5 }
  0x57   : > { %356 = vst [vmem:[%s775_s20 + $0x110] sm:$0xff] %v280_v9  ;;  %v236_v9 = vld [vmem:[%s756_s27 + $0x220] sm:$0xff]  ;;  %v313_v12 = vadd.f32 %v763_v1, %v235_v7 }
  0x58   : > { %357 = vst [vmem:[%s775_s20 + $0x118] sm:$0xff] %v281_v11  ;;  %v237_v11 = vld [vmem:[%s756_s27 + $0x228] sm:$0xff]  ;;  %v314_v14 = vadd.f32 %v763_v1, %v236_v9 }
  0x59   : > { %358 = vst [vmem:[%s775_s20 + $0x120] sm:$0xff] %v282_v13  ;;  %v238_v13 = vld [vmem:[%s756_s27 + $0x230] sm:$0xff]  ;;  %v315_v16 = vadd.f32 %v763_v1, %v237_v11 }
  0x5a   : > { %359 = vst [vmem:[%s775_s20 + $0x128] sm:$0xff] %v283_v15  ;;  %v239_v15 = vld [vmem:[%s756_s27 + $0x238] sm:$0xff]  ;;  %v316_v18 = vadd.f32 %v763_v1, %v238_v13 }
  0x5b   : > { %360 = vst [vmem:[%s775_s20 + $0x130] sm:$0xff] %v284_v17  ;;  %v240_v17 = vld [vmem:[%s756_s27 + $0x240] sm:$0xff]  ;;  %v317_v20 = vadd.f32 %v763_v1, %v239_v15 }
  0x5c   : > { %361 = vst [vmem:[%s775_s20 + $0x138] sm:$0xff] %v285_v19  ;;  %v241_v19 = vld [vmem:[%s756_s27 + $0x248] sm:$0xff]  ;;  %v318_v22 = vadd.f32 %v763_v1, %v240_v17 }
  0x5d   : > { %362 = vst [vmem:[%s775_s20 + $0x140] sm:$0xff] %v286_v21  ;;  %v242_v21 = vld [vmem:[%s756_s27 + $0x250] sm:$0xff]  ;;  %v319_v24 = vadd.f32 %v763_v1, %v241_v19 }
  0x5e   : > { %363 = vst [vmem:[%s775_s20 + $0x148] sm:$0xff] %v287_v23  ;;  %v243_v23 = vld [vmem:[%s756_s27 + $0x258] sm:$0xff] }
  0x5f   : > { %364 = vst [vmem:[%s775_s20 + $0x150] sm:$0xff] %v288_v25  ;;  %v320_v25 = vadd.f32 %v763_v1, %v242_v21  ;;  %v321_v26 = vadd.f32 %v763_v1, %v243_v23 }
  0x60   : > { %365 = vst [vmem:[%s775_s20 + $0x158] sm:$0xff] %v289_v27 }
  0x61   : > { %366 = vst [vmem:[%s775_s20 + $0x160] sm:$0xff] %v290_v29 }
  0x62   : > { %367 = vst [vmem:[%s775_s20 + $0x168] sm:$0xff] %v291_v31 }
  0x63   : > { %368 = vst [vmem:[%s775_s20 + $0x170] sm:$0xff] %v292_v33 }
  0x64   : > { %369 = vst [vmem:[%s775_s20 + $0x178] sm:$0xff] %v293_v35 }
  0x65   : > { %370 = vst [vmem:[%s775_s20 + $0x180] sm:$0xff] %v294_v37 }
  0x66   : > { %371 = vst [vmem:[%s775_s20 + $0x188] sm:$0xff] %v295_v39 }
  0x67   : > { %372 = vst [vmem:[%s775_s20 + $0x190] sm:$0xff] %v296_v41 }
  0x68   : > { %373 = vst [vmem:[%s775_s20 + $0x198] sm:$0xff] %v297_v43 }
  0x69   : > { %374 = vst [vmem:[%s775_s20 + $0x1a0] sm:$0xff] %v298_v45 }
  0x6a   : > { %375 = vst [vmem:[%s775_s20 + $0x1a8] sm:$0xff] %v299_v47 }
  0x6b   : > { %376 = vst [vmem:[%s775_s20 + $0x1b0] sm:$0xff] %v300_v49 }
  0x6c   : > { %377 = vst [vmem:[%s775_s20 + $0x1b8] sm:$0xff] %v301_v51 }
  0x6d   : > { %378 = vst [vmem:[%s775_s20 + $0x1c0] sm:$0xff] %v302_v53 }
  0x6e   : > { %379 = vst [vmem:[%s775_s20 + $0x1c8] sm:$0xff] %v303_v55 }
  0x6f   : > { %380 = vst [vmem:[%s775_s20 + $0x1d0] sm:$0xff] %v304_v57 }
  0x70   : > { %381 = vst [vmem:[%s775_s20 + $0x1d8] sm:$0xff] %v305_v59 }
  0x71   : > { %382 = vst [vmem:[%s775_s20 + $0x1e0] sm:$0xff] %v306_v61 }
  0x72   : > { %383 = vst [vmem:[%s775_s20 + $0x1e8] sm:$0xff] %v307_v63 }
  0x73   : > { %384 = vst [vmem:[%s775_s20 + $0x1f0] sm:$0xff] %v308_v2 }
  0x74   : > { %385 = vst [vmem:[%s775_s20 + $0x1f8] sm:$0xff] %v309_v4 }
  0x75   : > { %386 = vst [vmem:[%s775_s20 + $0x200] sm:$0xff] %v310_v6 }
  0x76   : > { %387 = vst [vmem:[%s775_s20 + $0x208] sm:$0xff] %v311_v8 }
  0x77   : > { %388 = vst [vmem:[%s775_s20 + $0x210] sm:$0xff] %v312_v10 }
  0x78   : > { %389 = vst [vmem:[%s775_s20 + $0x218] sm:$0xff] %v313_v12 }
  0x79   : > { %390 = vst [vmem:[%s775_s20 + $0x220] sm:$0xff] %v314_v14 }
  0x7a   : > { %391 = vst [vmem:[%s775_s20 + $0x228] sm:$0xff] %v315_v16 }
  0x7b   : > { %392 = vst [vmem:[%s775_s20 + $0x230] sm:$0xff] %v316_v18 }
  0x7c   : > { %393 = vst [vmem:[%s775_s20 + $0x238] sm:$0xff] %v317_v20 }
  0x7d   : > { %394 = vst [vmem:[%s775_s20 + $0x240] sm:$0xff] %v318_v22 }
  0x7e   : > { %395 = vst [vmem:[%s775_s20 + $0x248] sm:$0xff] %v319_v24 }
  0x7f   : > { %396 = vst [vmem:[%s775_s20 + $0x250] sm:$0xff] %v320_v25 }
  0x80   : > { %397 = vst [vmem:[%s775_s20 + $0x258] sm:$0xff] %v321_v26 }
  0x81   : > { %613 = shalt.err (!%p610_p7)
}
  0x82   : > { %s656_s23 = smov 512   ;;  %s657_s24 = smov 32  }
  0x83   : > { %508 = dma.vmem_to_hbm [thread:$0]  (%p722_p11), %s413_s4, 9728, %s415_s5, %s399_s6, %s656_s23, %s656_s23, %s657_s24  }
  0x84 PF: > { %s429_s25 = sand.u32 1, %s640_s11   ;;  %p515_p8 = pnand %p490_p9, %p726_p12 }
  0x85   : > { %s430_s26 = scalar_lea.sflag [#allocation5], %s429_s25 }
  0x86   : > { %p516_p10 = pneg %p515_p8 }
  0x88   : > { %635 = dma.done.wait (%p516_p10), %s430_s26, 9728  }
  0x89   : > { %637 = vsyncadd (%p516_p10), %s430_s26, 4294957568  ;;  %p16_p0 = scmp.ge.s32.totalorder %s701_s16, 4   ;;  %s1035_s11 = smov %s644_s12 }
  0x8a   : > { %s1036_s12 = smov %s648_s13  ;;  %s1037_s13 = smov %s713_s19 }
  0x8b   : > { %s1038_s14 = smov %s701_s16  ;;  %18 = sbr.rel (!%p16_p0) target bundleno = 7 (0x7), region = 73 }
  0x90   :  { %436 = vsyncpa [#allocation4], 1 }
  0x91   :  { %438 = vsyncpa [#allocation4 + $0x1], 1 }
  0x92   :  { %439 = vsyncpa [#allocation5], 1 }
  0x93   :  { %441 = vsyncpa [#allocation5 + $0x1], 1 }

</bundles_post_ra>
